<compile_context>
chip_gen: v7x
topology: tpu7x:2x2x1
jax: 0.10.0
libtpu: 0.0.40
codegen_flags: <defaults>
</compile_context>

<pallas_src>
import functools
import math

import jax
import jax.numpy as jnp
from jax.experimental import pallas as pl
from jax.experimental.pallas import tpu as pltpu


def _round_up(x: int, m: int) -> int:
    return ((x + m - 1) // m) * m


def _embed_gather_kernel(ids_ref, table_ref, o_ref, buf_ref, sems,
                         *, tm, window, scale):
    """Gather `tm` embedding rows for this tile, scale, and store densely.

    ids_ref   : SMEM (n_pad,) int32          -- scalar-prefetched token ids
    table_ref : HBM  (vocab, d_model)        -- raw ref, manual DMA gather
    o_ref     : VMEM (tm, d_model) out tile
    buf_ref   : VMEM (tm, d_model) gather scratch
    sems      : DMA semaphores, (window,)
    """
    base = pl.program_id(0) * tm

    # Sliding-window pipelined gather: keep `window` row DMAs in flight.
    @pl.loop(0, tm + window)
    def _(t):
        slot = t % window

        # Retire the copy that previously occupied this semaphore slot
        # (wait BEFORE reusing the slot so completions can't be confused).
        @pl.when(t >= window)
        def _():
            pltpu.make_async_copy(
                table_ref.at[pl.ds(0, 1), :],          # shape-only for wait
                buf_ref.at[pl.ds(t - window, 1), :],
                sems.at[slot],
            ).wait()

        # Issue the gather DMA for token `t` of this tile.
        @pl.when(t < tm)
        def _():
            row = ids_ref[base + t]
            pltpu.make_async_copy(
                table_ref.at[pl.ds(row, 1), :],
                buf_ref.at[pl.ds(t, 1), :],
                sems.at[slot],
            ).start()

    # Scale in f32 and write one dense (tm, d_model) tile.
    o_ref[...] = (buf_ref[...].astype(jnp.float32) * scale).astype(o_ref.dtype)


@functools.partial(jax.jit, static_argnames=("tm", "window"))
def text_embedding_forward(ids, table, *, tm=256, window=8):
    """ids: integer array of any shape; table: (vocab, d_model).

    Returns embeddings of shape ids.shape + (d_model,), scaled by sqrt(d_model).
    """
    d_model = table.shape[1]
    orig_shape = ids.shape
    n = ids.size
    ids_flat = ids.reshape(n).astype(jnp.int32)

    # Effective row tile: multiple of 8 sublanes, no larger than needed.
    tm_eff = _round_up(min(tm, _round_up(n, 8)), 8)
    n_pad = _round_up(n, tm_eff)
    if n_pad != n:
        # Pad with id 0 (always valid); padded rows are sliced off below.
        ids_flat = jnp.concatenate(
            [ids_flat, jnp.zeros((n_pad - n,), jnp.int32)])

    scale = float(math.sqrt(d_model))

    out = pl.pallas_call(
        functools.partial(_embed_gather_kernel,
                          tm=tm_eff, window=window, scale=scale),
        out_shape=jax.ShapeDtypeStruct((n_pad, d_model), table.dtype),
        grid_spec=pltpu.PrefetchScalarGridSpec(
            num_scalar_prefetch=1,                       # token ids -> SMEM
            grid=(n_pad // tm_eff,),
            in_specs=[
                pl.BlockSpec(memory_space=pl.ANY),       # table stays in HBM
            ],
            out_specs=pl.BlockSpec((tm_eff, d_model), lambda i, ids: (i, 0)),
            scratch_shapes=[
                pltpu.VMEM((tm_eff, d_model), table.dtype),   # gather buffer
                pltpu.SemaphoreType.DMA((window,)),           # DMA window
            ],
        ),
        compiler_params=pltpu.CompilerParams(
            dimension_semantics=("parallel",),           # v7x: split rows on 2 TCs
        ),
    )(ids_flat, table)

    if n_pad != n:
        out = out[:n]
    return out.reshape(*orig_shape, d_model)


if __name__ == "__main__":
    # Small shapes consistent with the module: vocab_size=128, d_model=32.
    batch, seq, vocab, d_model = 2, 8, 128, 32

    key = jax.random.PRNGKey(0)
    k_ids, k_tbl = jax.random.split(key)

    # nn.Embedding default init ~ N(0, 1).
    table = jax.random.normal(k_tbl, (vocab, d_model), jnp.float32)
    ids = jax.random.randint(k_ids, (batch, seq), 0, vocab, dtype=jnp.int32)

    out = text_embedding_forward(ids, table)
    jax.block_until_ready(out)

    # Correctness check against a plain-JAX reference of the PyTorch forward.
    ref = (jnp.take(table, ids.reshape(-1), axis=0)
           .reshape(batch, seq, d_model) * math.sqrt(d_model))
    assert out.shape == (batch, seq, d_model)
    assert jnp.allclose(out, ref, atol=1e-5, rtol=1e-5), "mismatch vs reference"

    print("KERNEL_OK")
</pallas_src>

<mosaic_0001>
module attributes {stable_mosaic.version = 11 : i64} {
  func.func @_embed_gather_kernel(%arg0: i32, %arg1: memref<16xi32, #tpu.memory_space<smem>>, %arg2: memref<128x32xf32, #tpu.memory_space<any>>, %arg3: memref<16x32xf32, #tpu.memory_space<vmem>>, %arg4: memref<16x32xf32, #tpu.memory_space<vmem>>, %arg5: memref<8x!tpu.dma_semaphore, #tpu.memory_space<semaphore_mem>>) attributes {dimension_semantics = [#tpu.dimension_semantics<parallel>], iteration_bounds = array<i64: 1>, scalar_prefetch = 1 : i64, scratch_operands = 2 : i64, tpu.core_type = #tpu.core_type<tc>, window_params = [{}, {transform_indices = @transform_1, window_bounds = array<i64: 16, 32>}]} {
    %c16_i32 = arith.constant 16 : i32
    %0 = arith.muli %arg0, %c16_i32 : i32
    %c0_i32 = arith.constant 0 : i32
    %c24_i32 = arith.constant 24 : i32
    %1 = arith.addi %c0_i32, %c24_i32 : i32
    %c1_i32 = arith.constant 1 : i32
    scf.for %arg6 = %c0_i32 to %1 step %c1_i32  : i32 {
      %c1_i32_4 = arith.constant 1 : i32
      %6 = arith.muli %arg6, %c1_i32_4 : i32
      %c0_i32_5 = arith.constant 0 : i32
      %7 = arith.addi %c0_i32_5, %6 : i32
      %c8_i32 = arith.constant 8 : i32
      %c0_i32_6 = arith.constant 0 : i32
      %8 = arith.cmpi eq, %c8_i32, %c0_i32_6 : i32
      %c1_i32_7 = arith.constant 1 : i32
      %9 = arith.select %8, %c1_i32_7, %c8_i32 : i32
      %10 = arith.remsi %7, %9 : i32
      %c0_i32_8 = arith.constant 0 : i32
      %11 = arith.cmpi ne, %10, %c0_i32_8 : i32
      %c0_i32_9 = arith.constant 0 : i32
      %12 = arith.cmpi slt, %10, %c0_i32_9 : i32
      %c0_i32_10 = arith.constant 0 : i32
      %13 = arith.cmpi slt, %9, %c0_i32_10 : i32
      %14 = arith.xori %12, %13 : i1
      %15 = arith.andi %14, %11 : i1
      %16 = arith.addi %10, %9 : i32
      %17 = arith.select %15, %16, %10 : i32
      %c8_i32_11 = arith.constant 8 : i32
      %18 = arith.cmpi sge, %7, %c8_i32_11 : i32
      %19 = arith.extui %18 : i1 to i32
      %c0_i32_12 = arith.constant 0 : i32
      %20 = arith.cmpi ne, %19, %c0_i32_12 : i32
      scf.if %20 {
        %c8_i32_15 = arith.constant 8 : i32
        %24 = arith.subi %7, %c8_i32_15 : i32
        %c0_i32_16 = arith.constant 0 : i32
        %c0_i32_17 = arith.constant 0 : i32
        %25 = tpu.memref_slice %arg2[%c0_i32_16, %c0_i32_17] : memref<128x32xf32, #tpu.memory_space<any>> -> memref<1x32xf32, #tpu.memory_space<any>>
        %c0_i32_18 = arith.constant 0 : i32
        %26 = tpu.memref_slice %arg4[%24, %c0_i32_18] : memref<16x32xf32, #tpu.memory_space<vmem>> -> memref<1x32xf32, #tpu.memory_space<vmem>>
        %27 = tpu.memref_slice %arg5[%17] : memref<8x!tpu.dma_semaphore, #tpu.memory_space<semaphore_mem>> -> memref<1x!tpu.dma_semaphore, #tpu.memory_space<semaphore_mem>>
        %28 = tpu.memref_squeeze %27 : memref<1x!tpu.dma_semaphore, #tpu.memory_space<semaphore_mem>> -> memref<!tpu.dma_semaphore, #tpu.memory_space<semaphore_mem>>
        tpu.wait_dma2 semaphore(%28 : memref<!tpu.dma_semaphore, #tpu.memory_space<semaphore_mem>>) src(%25 : memref<1x32xf32, #tpu.memory_space<any>>) dst(%26 : memref<1x32xf32, #tpu.memory_space<vmem>>)
      } else {
      }
      %c16_i32_13 = arith.constant 16 : i32
      %21 = arith.cmpi slt, %7, %c16_i32_13 : i32
      %22 = arith.extui %21 : i1 to i32
      %c0_i32_14 = arith.constant 0 : i32
      %23 = arith.cmpi ne, %22, %c0_i32_14 : i32
      scf.if %23 {
        %24 = arith.addi %0, %7 : i32
        %25 = arith.index_cast %24 : i32 to index
        %26 = memref.load %arg1[%25] : memref<16xi32, #tpu.memory_space<smem>>
        %c0_i32_15 = arith.constant 0 : i32
        %27 = tpu.memref_slice %arg2[%26, %c0_i32_15] : memref<128x32xf32, #tpu.memory_space<any>> -> memref<1x32xf32, #tpu.memory_space<any>>
        %c0_i32_16 = arith.constant 0 : i32
        %28 = tpu.memref_slice %arg4[%7, %c0_i32_16] : memref<16x32xf32, #tpu.memory_space<vmem>> -> memref<1x32xf32, #tpu.memory_space<vmem>>
        %29 = tpu.memref_slice %arg5[%17] : memref<8x!tpu.dma_semaphore, #tpu.memory_space<semaphore_mem>> -> memref<1x!tpu.dma_semaphore, #tpu.memory_space<semaphore_mem>>
        %30 = tpu.memref_squeeze %29 : memref<1x!tpu.dma_semaphore, #tpu.memory_space<semaphore_mem>> -> memref<!tpu.dma_semaphore, #tpu.memory_space<semaphore_mem>>
        tpu.enqueue_dma source(%27 : memref<1x32xf32, #tpu.memory_space<any>>) target(%28 : memref<1x32xf32, #tpu.memory_space<vmem>>) target_semaphore(%30 : memref<!tpu.dma_semaphore, #tpu.memory_space<semaphore_mem>>)
      } else {
      }
    }
    %c24_i32_0 = arith.constant 24 : i32
    %c0 = arith.constant 0 : index
    %c0_1 = arith.constant 0 : index
    %2 = vector.load %arg4[%c0, %c0_1] : memref<16x32xf32, #tpu.memory_space<vmem>>, vector<16x32xf32>
    %cst = arith.constant 5.65685415 : f32
    %3 = vector.broadcast %cst : f32 to vector<16x32xf32>
    %4 = arith.mulf %2, %3 : vector<16x32xf32>
    %c0_2 = arith.constant 0 : index
    %c0_3 = arith.constant 0 : index
    %5 = vector.load %arg3[%c0_2, %c0_3] : memref<16x32xf32, #tpu.memory_space<vmem>>, vector<16x32xf32>
    tpu.vector_store %arg3[%c0_2, %c0_3], %4 {strides = array<i32>} : memref<16x32xf32, #tpu.memory_space<vmem>>, vector<16x32xf32>,
    return
  }
  func.func @transform_1(%arg0: i32, %arg1: memref<16xi32, #tpu.memory_space<smem>>) -> (i32, i32) {
    %c0_i32 = arith.constant 0 : i32
    %c0_i32_0 = arith.constant 0 : i32
    return %arg0, %c0_i32 : i32, i32
  }
}

</mosaic_0001>

<bundles_post_ra>
// kernel: text_embedding_forward.1
= control target key start
LH: loop header
LB: loop body
LE: loop exit
PB: predicated region body
PF: predicated region fallthrough
CT: control target
= control target key end

     0   :  { %s306_s0 = inlined_call_operand.vmem [shape: s32[16], index: 0, kind: input, shape index: {}]   ;;  %s307_s1 = inlined_call_operand.vmem [shape: f32[128,32], index: 1, kind: input, shape index: {}]   ;;  %s308_s2 = inlined_call_operand.hbm [shape: f32[16,32], index: 2, kind: output, shape index: {}]  }
   0x1   :  { %s7_s11 = sshll.u32 %s306_s0, 4  ;;  %s8_s11 = int_to_ptr.vmem [resolvable:$true] %s7_s11 }
   0x2   :  { %s219_s12 = scalar_lea.vmem %s8_s11, 16  ;;  %p224_p1 = scmp.lt.s32.totalorder %s8_s11, %s8_s11 }
   0x3   :  { %p220_p0 = scmp.ne.s32.totalorder %s8_s11, %s219_s12  ;;  %p225_p2 = scmp.lt.s32.totalorder %s219_s12, %s219_s12 }
   0x5   :  { %p226_p3 = por %p225_p2, %p224_p1 }
   0x7   :  { %p227_p4 = pnand %p226_p3, %p220_p0 }
   0x9   :  { %230 = shalt.err (!%p227_p4)  }
   0xa   :  { %s269_s13 = smov [#allocation5]  }
   0xb   :  { %10 = dma.vmem_to_smem %s8_s11, 16, %s269_s13, [#allocation4] }
   0xc   :  { %257 = dma.done.wait [#allocation4], 16 }
   0xd   :  { %258 = vsyncadd [#allocation4], 4294967280 }
   0xe   :  { %12 = sfence }
   0xf   :  { %13 = vsyncpa [#allocation7], 0  ;;  %s265_s14 = smov 0  }
  0x10 LB: > { %p21_p5 = scmp.lt.s32.totalorder %s267_s14, 0  ;;  %s22_s0 = ssub.s32 0, %s267_s14  ;;  %s267_s14 = sphi %s265_s14, %s20_s14  }
  0x11   : > { %s191_s15 = smin.u32 %s267_s14, %s22_s0  ;;  %p206_p6 = scmp.ge.s32.totalorder %s267_s14, 8 }
  0x12   : > { %s24_s16 = sand.u32 7, %s191_s15  }
  0x13   : > { %s25_s17 = ssub.s32 0, %s24_s16 }
  0x14   : > { %s310_s17 = smov (!%p21_p5, %s25_s17), %s24_s16 }
  0x15   : > { %p193_p7 = scmp.lt.s32.totalorder %s310_s17, 0  ;;  %s31_s18 = sadd.s32 8, %s310_s17 }
  0x17   : > { %s312_s18 = smov (!%p193_p7, %s31_s18), %s310_s17 }
  0x18   : > { %s37_s19 = scalar_lea.sflag [#allocation3], %s312_s18 }
  0x19   : > { %260 = dma.done.wait (%p206_p6), %s37_s19, 16 }
  0x1a   : > { %262 = vsyncadd (%p206_p6), %s37_s19, 4294967280  ;;  %p195_p8 = scmp.ge.s32.totalorder %s267_s14, 16 }
  0x1b   : > { %s46_s20 = sld [smem:[#allocation5 + %s267_s14]] (!%p195_p8)  ;;  %s48_s24 = scalar_lea.vmem (!%p195_p8), [#allocation2], %s267_s14 }
  0x1c   : > { %44 = sbr.rel (%p195_p8) target bundleno = 37 (0x25), region = 16 }
  0x21   : > { %s47_s23 = scalar_lea.vmem (!%p195_p8), %s307_s1, %s46_s20 }
  0x22   : > { %v67_v0 = vld [vmem:[%s47_s23] sm:$0x1] (!%p195_p8) }
  0x23   : > { %68 = vst [vmem:[%s48_s24] sm:$0x1] %v67_v0 }
  0x24   : > { %93 = vsyncadd %s37_s19, 16 }
  0x25 PF: > { %s20_s14 = sadd.s32 1, %s267_s14  }
  0x26   : > { %p17_p9 = scmp.ge.s32.totalorder %s20_s14, 24  }
  0x27   :  { %vm98_vm0 = vcmask (%p17_p9), 261120   ;;  %s270_s25 = smov (%p17_p9), [#allocation6]  }
  0x28   :  { %19 = sbr.rel (!%p17_p9) target bundleno = 16 (0x10), region = 86  ;;  %s106_s26 = sshll.u32 (%p17_p9), %s270_s25, 4  ;;  %s107_s26 = int_to_ptr.vmem [resolvable:$true] %s106_s26 }
  0x29   :  { %s231_s27 = scalar_lea.vmem (%p17_p9), %s107_s26, 256  ;;  %p236_p11 = scmp.lt.s32.totalorder (%p17_p9), %s107_s26, %s107_s26 }
  0x2a   :  { %p232_p10 = scmp.ne.s32.totalorder (%p17_p9), %s107_s26, %s231_s27  ;;  %p237_p12 = scmp.lt.s32.totalorder (%p17_p9), %s231_s27, %s231_s27 }
  0x2c   :  { %v94_v1 = vld [vmem:[#allocation2] sm:$0xff] (%p17_p9)  ;;  %v95_v2 = vld [vmem:[#allocation2 + $0x8] sm:$0xff] (%p17_p9)  ;;  %p238_p13 = por (%p17_p9), %p237_p12, %p236_p11 }
  0x2d   :  { %v96_v3 = vmul.f32 (%p17_p9), 5.656854, %v94_v1  ;;  %v97_v4 = vmul.f32 (%p17_p9), 5.656854, %v95_v2 }
  0x2e   :  { %p239_p0 = pnand (%p17_p9), %p238_p13, %p232_p10 }
  0x2f   :  { %99 = vst.msk [vmem:[#allocation6] sm:$0xff] %vm98_vm0, %v96_v3  ;;  %100 = vst.msk [vmem:[#allocation6 + $0x8] sm:$0xff] %vm98_vm0, %v97_v4 }
  0x30   :  { %242 = shalt.err (!%p239_p0)
}
  0x31   :  { %s243_s1 = scalar_lea.hbm %s308_s2, 256 }
  0x32   :  { %p244_p1 = scmp.ne.s32.totalorder %s308_s2, %s243_s1  ;;  %p247_p2 = scmp.lt.u32.totalorder %s243_s1, %s308_s2 }
  0x34   :  { %p249_p3 = pnand %p247_p2, %p244_p1 }
  0x36   :  { %252 = shalt.err (!%p249_p3)
}
  0x37   :  { %s271_s6 = smov 128   ;;  %s272_s7 = smov 8  }
  0x38   :  { %112 = dma.vmem_to_hbm [thread:$0]  %s107_s26, 256, %s308_s2, [#allocation7], %s271_s6, %s271_s6, %s272_s7  }
  0x39   :  { %263 = dma.done.wait [#allocation7], 256  }
  0x3a   :  { %264 = vsyncadd [#allocation7], 4294967040 }
  0x3b   :  { %116 = vsyncpa [#allocation7], 1 }
  0x3c   :  { %117 = vsyncmov [#allocation3] }
  0x3f   :  { %s118_s10 = vpop.sfrf %117 }
  0x40   :  { %p196_p4 = scmp.ne.s32.totalorder %s118_s10, 0 }
  0x42   :  { %122 = shalt.err (%p196_p4)  }
  0x43   :  { %124 = vsyncmov [#allocation3 + $0x1] }
  0x46   :  { %s125_s11 = vpop.sfrf %124 }
  0x47   :  { %p197_p5 = scmp.ne.s32.totalorder %s125_s11, 0 }
  0x49   :  { %129 = shalt.err (%p197_p5)  }
  0x4a   :  { %131 = vsyncmov [#allocation3 + $0x2] }
  0x4d   :  { %s132_s12 = vpop.sfrf %131 }
  0x4e   :  { %p198_p6 = scmp.ne.s32.totalorder %s132_s12, 0 }
  0x50   :  { %136 = shalt.err (%p198_p6)  }
  0x51   :  { %138 = vsyncmov [#allocation3 + $0x3] }
  0x54   :  { %s139_s13 = vpop.sfrf %138 }
  0x55   :  { %p199_p7 = scmp.ne.s32.totalorder %s139_s13, 0 }
  0x57   :  { %143 = shalt.err (%p199_p7)  }
  0x58   :  { %145 = vsyncmov [#allocation3 + $0x4] }
  0x5b   :  { %s146_s2 = vpop.sfrf %145 }
  0x5c   :  { %p200_p8 = scmp.ne.s32.totalorder %s146_s2, 0 }
  0x5e   :  { %150 = shalt.err (%p200_p8)  }
  0x5f   :  { %152 = vsyncmov [#allocation3 + $0x5] }
  0x62   :  { %s153_s14 = vpop.sfrf %152 }
  0x63   :  { %p201_p9 = scmp.ne.s32.totalorder %s153_s14, 0 }
  0x65   :  { %157 = shalt.err (%p201_p9)  }
  0x66   :  { %159 = vsyncmov [#allocation3 + $0x6] }
  0x69   :  { %s160_s0 = vpop.sfrf %159 }
  0x6a   :  { %p202_p10 = scmp.ne.s32.totalorder %s160_s0, 0 }
  0x6c   :  { %164 = shalt.err (%p202_p10)  }
  0x6d   :  { %166 = vsyncmov [#allocation3 + $0x7] }
  0x70   :  { %s167_s15 = vpop.sfrf %166 }
  0x71   :  { %p203_p11 = scmp.ne.s32.totalorder %s167_s15, 0 }
  0x73   :  { %171 = shalt.err (%p203_p11)  }

</bundles_post_ra>
